<compile_context>
chip_gen: v7x
topology: tpu7x:2x2x1
jax: 0.10.0
libtpu: 0.0.40
codegen_flags: <defaults>
</compile_context>

<pallas_src>
import functools

import jax
import jax.numpy as jnp
from jax.experimental import pallas as pl
from jax.experimental.pallas import tpu as pltpu

_LANES = 128
_SUBLANES = 8
_NUM_SHARDS = 2            # leading "parallel" grid axis (both TCs on v7x)
_MAX_TILE_ROWS = 4096      # (4096, 128) f32 = 2 MiB per input block
_MIN_KERNEL_ELEMS = 65536  # below this, XLA's fused reduction wins
_VMEM_LIMIT_BYTES = 40 * 1024 * 1024


def _masked_mse_kernel(pred_ref, targ_ref, num_ref, den_ref, *,
                       tile_rows, blocks_per_shard, valid_rows_last):
    k = pl.program_id(1)  # reduction (block) axis within a shard

    @pl.when(k == 0)
    def _init():
        num_ref[...] = jnp.zeros_like(num_ref)
        den_ref[...] = jnp.zeros_like(den_ref)

    folds = tile_rows // _SUBLANES

    def accumulate(row_mask):
        pred = pred_ref[...].astype(jnp.float32)
        targ = targ_ref[...].astype(jnp.float32)
        keep = targ != -1.0                      # sentinel: missing landmark
        if row_mask is not None:
            keep = jnp.logical_and(keep, row_mask)
        diff = pred - targ
        sq = jnp.where(keep, diff * diff, 0.0)
        cnt = jnp.where(keep, 1.0, 0.0)
        # Fold (tile_rows, 128) -> (8, 128): leading-axis sum lowers to plain
        # VPU vreg adds (no XLU), keeping the persistent accumulator tiny.
        num_ref[...] += sq.reshape(folds, _SUBLANES, _LANES).sum(axis=0)
        den_ref[...] += cnt.reshape(folds, _SUBLANES, _LANES).sum(axis=0)

    if valid_rows_last == tile_rows:
        # tile_rows divides rows_per_shard: no tail masking anywhere.
        accumulate(None)
    else:
        # Steady-state blocks: no row-mask VALU work in the hot loop.
        @pl.when(k < blocks_per_shard - 1)
        def _steady():
            accumulate(None)

        # Only the shard's last (partial) block pays for the tail row mask.
        @pl.when(k == blocks_per_shard - 1)
        def _tail():
            row_ids = jax.lax.broadcasted_iota(
                jnp.int32, (tile_rows, _LANES), 0)
            accumulate(row_ids < valid_rows_last)


def custom_mse_loss(predicted_landmarks, target_landmarks, *,
                    max_tile_rows=_MAX_TILE_ROWS,
                    min_kernel_elems=_MIN_KERNEL_ELEMS):
    """Masked MSE loss, matching CustomMSELoss.forward."""
    pred_f = predicted_landmarks.reshape(-1)
    targ_f = target_landmarks.reshape(-1)
    # f32/bf16 slabs go to the kernel as-is (cast after the DMA); only widen
    # exotic dtypes in the wrapper.
    if pred_f.dtype not in (jnp.float32, jnp.bfloat16):
        pred_f = pred_f.astype(jnp.float32)
    if targ_f.dtype not in (jnp.float32, jnp.bfloat16):
        targ_f = targ_f.astype(jnp.float32)

    n = pred_f.shape[0]

    # Tiny inputs: XLA's fused reduction beats a pallas_call launch.
    if n < min_kernel_elems:
        p32 = pred_f.astype(jnp.float32)
        t32 = targ_f.astype(jnp.float32)
        mask = (t32 != -1.0).astype(jnp.float32)
        return jnp.sum((p32 - t32) ** 2 * mask) / jnp.sum(mask)

    # Pad to a multiple of (shards * lanes): at most 255 elements.  Target
    # padding is -1 so the sentinel mask drops it.
    align = _NUM_SHARDS * _LANES
    pad = (-n) % align
    if pad:
        pred_f = jnp.pad(pred_f, (0, pad))
        targ_f = jnp.pad(targ_f, (0, pad), constant_values=-1.0)

    rows = (n + pad) // _LANES
    rows_per_shard = rows // _NUM_SHARDS
    pred3 = pred_f.reshape(_NUM_SHARDS, rows_per_shard, _LANES)
    targ3 = targ_f.reshape(_NUM_SHARDS, rows_per_shard, _LANES)

    # bf16 packs two rows per sublane -> tile_rows must be a multiple of 16.
    sub = _SUBLANES * (2 if (pred3.dtype == jnp.bfloat16 or
                             targ3.dtype == jnp.bfloat16) else 1)
    tile_rows = min(max_tile_rows, (rows_per_shard // sub) * sub)
    tile_rows = max(tile_rows, sub)
    blocks_per_shard = pl.cdiv(rows_per_shard, tile_rows)
    valid_rows_last = rows_per_shard - (blocks_per_shard - 1) * tile_rows

    kernel = functools.partial(
        _masked_mse_kernel,
        tile_rows=tile_rows,
        blocks_per_shard=blocks_per_shard,
        valid_rows_last=valid_rows_last,
    )

    part = jax.ShapeDtypeStruct((_NUM_SHARDS, _SUBLANES, _LANES), jnp.float32)
    itemsize_p = jnp.dtype(pred3.dtype).itemsize
    itemsize_t = jnp.dtype(targ3.dtype).itemsize
    bytes_accessed = (pred3.size * itemsize_p + targ3.size * itemsize_t
                      + 2 * _NUM_SHARDS * _SUBLANES * _LANES * 4)
    cost = pl.CostEstimate(flops=7 * n, transcendentals=0,
                           bytes_accessed=bytes_accessed)

    num_parts, den_parts = pl.pallas_call(
        kernel,
        out_shape=(part, part),
        grid_spec=pltpu.PrefetchScalarGridSpec(
            num_scalar_prefetch=0,
            grid=(_NUM_SHARDS, blocks_per_shard),
            in_specs=[
                pl.BlockSpec((None, tile_rows, _LANES), lambda c, k: (c, k, 0)),
                pl.BlockSpec((None, tile_rows, _LANES), lambda c, k: (c, k, 0)),
            ],
            out_specs=(
                pl.BlockSpec((None, _SUBLANES, _LANES), lambda c, k: (c, 0, 0)),
                pl.BlockSpec((None, _SUBLANES, _LANES), lambda c, k: (c, 0, 0)),
            ),
        ),
        compiler_params=pltpu.CompilerParams(
            dimension_semantics=("parallel", "arbitrary"),
            vmem_limit_bytes=_VMEM_LIMIT_BYTES,
        ),
        cost_estimate=cost,
    )(pred3, targ3)

    # Tiny final reduction + single divide in the wrapper (enables the
    # per-core partial outputs and the tail handling above).
    return jnp.sum(num_parts) / jnp.sum(den_parts)


if __name__ == "__main__":
    key = jax.random.PRNGKey(0)

    def make_case(k, shape, dtype=jnp.float32, missing_frac=0.25):
        k_pred, k_targ, k_mask = jax.random.split(k, 3)
        pred = jax.random.normal(k_pred, shape, dtype=jnp.float32).astype(dtype)
        targ = jax.random.normal(k_targ, shape, dtype=jnp.float32).astype(dtype)
        missing = jax.random.uniform(k_mask, shape) < missing_frac
        targ = jnp.where(missing, jnp.asarray(-1.0, dtype), targ)
        return pred, targ

    def reference(pred, targ):
        p = pred.astype(jnp.float32)
        t = targ.astype(jnp.float32)
        mask = (t != -1.0).astype(jnp.float32)
        return jnp.sum((p - t) ** 2 * mask) / jnp.sum(mask)

    # (name, shape, dtype, wrapper kwargs, rtol)
    cases = [
        ("tiny / pure-JAX path", (2, 68, 2), jnp.float32, {}, 1e-5),
        ("single-block kernel path", (512, 68, 2), jnp.float32, {}, 1e-5),
        ("multi-block + tail + pad", (517, 68, 2), jnp.float32,
         {"max_tile_rows": 64}, 1e-5),
        ("bf16 multi-block + tail", (512, 68, 2), jnp.bfloat16,
         {"max_tile_rows": 48}, 1e-4),
    ]

    keys = jax.random.split(key, len(cases))
    ok = True
    for (name, shape, dtype, kwargs, rtol), k in zip(cases, keys):
        pred, targ = make_case(k, shape, dtype)
        loss = jax.block_until_ready(custom_mse_loss(pred, targ, **kwargs))
        ref = reference(pred, targ)
        if not jnp.allclose(loss, ref, rtol=rtol, atol=1e-5):
            ok = False
            print(f"MISMATCH [{name}] shape={shape} dtype={dtype}: "
                  f"kernel={loss} ref={ref}")

    if ok:
        print("KERNEL_OK")
</pallas_src>

<mosaic_0001>
module attributes {stable_mosaic.version = 11 : i64} {
  func.func @_masked_mse_kernel(%arg0: i32, %arg1: i32, %arg2: memref<1x272x128xf32, #tpu.memory_space<vmem>>, %arg3: memref<1x272x128xf32, #tpu.memory_space<vmem>>, %arg4: memref<1x8x128xf32, #tpu.memory_space<vmem>>, %arg5: memref<1x8x128xf32, #tpu.memory_space<vmem>>) attributes {dimension_semantics = [#tpu.dimension_semantics<parallel>, #tpu.dimension_semantics<arbitrary>], iteration_bounds = array<i64: 2, 1>, scalar_prefetch = 0 : i64, scratch_operands = 0 : i64, tpu.core_type = #tpu.core_type<tc>, window_params = [{transform_indices = @transform_0, window_bounds = array<i64: 1, 272, 128>}, {transform_indices = @transform_1, window_bounds = array<i64: 1, 272, 128>}, {transform_indices = @transform_2, window_bounds = array<i64: 1, 8, 128>}, {transform_indices = @transform_3, window_bounds = array<i64: 1, 8, 128>}]} {
    %c0_i32 = arith.constant 0 : i32
    %0 = arith.cmpi eq, %arg1, %c0_i32 : i32
    %1 = arith.extui %0 : i1 to i32
    %c0_i32_0 = arith.constant 0 : i32
    %2 = arith.cmpi ne, %1, %c0_i32_0 : i32
    scf.if %2 {
      %cst_23 = arith.constant 0.000000e+00 : f32
      %32 = vector.broadcast %cst_23 : f32 to vector<8x128xf32>
      %c0_24 = arith.constant 0 : index
      %c0_25 = arith.constant 0 : index
      %c0_26 = arith.constant 0 : index
      %33 = vector.load %arg4[%c0_24, %c0_25, %c0_26] : memref<1x8x128xf32, #tpu.memory_space<vmem>>, vector<1x8x128xf32>
      %34 = vector.shape_cast %33 : vector<1x8x128xf32> to vector<8x128xf32>
      %35 = vector.shape_cast %32 : vector<8x128xf32> to vector<1x8x128xf32>
      tpu.vector_store %arg4[%c0_24, %c0_25, %c0_26], %35 {strides = array<i32>} : memref<1x8x128xf32, #tpu.memory_space<vmem>>, vector<1x8x128xf32>,
      %cst_27 = arith.constant 0.000000e+00 : f32
      %36 = vector.broadcast %cst_27 : f32 to vector<8x128xf32>
      %c0_28 = arith.constant 0 : index
      %c0_29 = arith.constant 0 : index
      %c0_30 = arith.constant 0 : index
      %37 = vector.load %arg5[%c0_28, %c0_29, %c0_30] : memref<1x8x128xf32, #tpu.memory_space<vmem>>, vector<1x8x128xf32>
      %38 = vector.shape_cast %37 : vector<1x8x128xf32> to vector<8x128xf32>
      %39 = vector.shape_cast %36 : vector<8x128xf32> to vector<1x8x128xf32>
      tpu.vector_store %arg5[%c0_28, %c0_29, %c0_30], %39 {strides = array<i32>} : memref<1x8x128xf32, #tpu.memory_space<vmem>>, vector<1x8x128xf32>,
    } else {
    }
    %c0 = arith.constant 0 : index
    %c0_1 = arith.constant 0 : index
    %c0_2 = arith.constant 0 : index
    %3 = vector.load %arg2[%c0, %c0_1, %c0_2] : memref<1x272x128xf32, #tpu.memory_space<vmem>>, vector<1x272x128xf32>
    %4 = vector.shape_cast %3 : vector<1x272x128xf32> to vector<272x128xf32>
    %c0_3 = arith.constant 0 : index
    %c0_4 = arith.constant 0 : index
    %c0_5 = arith.constant 0 : index
    %5 = vector.load %arg3[%c0_3, %c0_4, %c0_5] : memref<1x272x128xf32, #tpu.memory_space<vmem>>, vector<1x272x128xf32>
    %6 = vector.shape_cast %5 : vector<1x272x128xf32> to vector<272x128xf32>
    %cst = arith.constant -1.000000e+00 : f32
    %7 = vector.broadcast %cst : f32 to vector<272x128xf32>
    %8 = arith.cmpf one, %6, %7 : vector<272x128xf32>
    %9 = arith.subf %4, %6 : vector<272x128xf32>
    %10 = arith.mulf %9, %9 : vector<272x128xf32>
    %cst_6 = arith.constant 0.000000e+00 : f32
    %11 = vector.broadcast %cst_6 : f32 to vector<272x128xf32>
    %12 = arith.select %8, %10, %11 : vector<272x128xi1>, vector<272x128xf32>
    %cst_7 = arith.constant 1.000000e+00 : f32
    %cst_8 = arith.constant 0.000000e+00 : f32
    %13 = vector.broadcast %cst_7 : f32 to vector<272x128xf32>
    %14 = vector.broadcast %cst_8 : f32 to vector<272x128xf32>
    %15 = arith.select %8, %13, %14 : vector<272x128xi1>, vector<272x128xf32>
    %c0_9 = arith.constant 0 : index
    %c0_10 = arith.constant 0 : index
    %c0_11 = arith.constant 0 : index
    %16 = vector.load %arg4[%c0_9, %c0_10, %c0_11] : memref<1x8x128xf32, #tpu.memory_space<vmem>>, vector<1x8x128xf32>
    %17 = vector.shape_cast %16 : vector<1x8x128xf32> to vector<8x128xf32>
    %18 = vector.shape_cast %12 : vector<272x128xf32> to vector<34x8x128xf32>
    %cst_12 = arith.constant dense<0.000000e+00> : vector<8x128xf32>
    %19 = vector.multi_reduction <add>, %18, %cst_12 [0] : vector<34x8x128xf32> to vector<8x128xf32>
    %20 = arith.addf %17, %19 : vector<8x128xf32>
    %c0_13 = arith.constant 0 : index
    %c0_14 = arith.constant 0 : index
    %c0_15 = arith.constant 0 : index
    %21 = vector.load %arg4[%c0_13, %c0_14, %c0_15] : memref<1x8x128xf32, #tpu.memory_space<vmem>>, vector<1x8x128xf32>
    %22 = vector.shape_cast %21 : vector<1x8x128xf32> to vector<8x128xf32>
    %23 = vector.shape_cast %20 : vector<8x128xf32> to vector<1x8x128xf32>
    tpu.vector_store %arg4[%c0_13, %c0_14, %c0_15], %23 {strides = array<i32>} : memref<1x8x128xf32, #tpu.memory_space<vmem>>, vector<1x8x128xf32>,
    %c0_16 = arith.constant 0 : index
    %c0_17 = arith.constant 0 : index
    %c0_18 = arith.constant 0 : index
    %24 = vector.load %arg5[%c0_16, %c0_17, %c0_18] : memref<1x8x128xf32, #tpu.memory_space<vmem>>, vector<1x8x128xf32>
    %25 = vector.shape_cast %24 : vector<1x8x128xf32> to vector<8x128xf32>
    %26 = vector.shape_cast %15 : vector<272x128xf32> to vector<34x8x128xf32>
    %cst_19 = arith.constant dense<0.000000e+00> : vector<8x128xf32>
    %27 = vector.multi_reduction <add>, %26, %cst_19 [0] : vector<34x8x128xf32> to vector<8x128xf32>
    %28 = arith.addf %25, %27 : vector<8x128xf32>
    %c0_20 = arith.constant 0 : index
    %c0_21 = arith.constant 0 : index
    %c0_22 = arith.constant 0 : index
    %29 = vector.load %arg5[%c0_20, %c0_21, %c0_22] : memref<1x8x128xf32, #tpu.memory_space<vmem>>, vector<1x8x128xf32>
    %30 = vector.shape_cast %29 : vector<1x8x128xf32> to vector<8x128xf32>
    %31 = vector.shape_cast %28 : vector<8x128xf32> to vector<1x8x128xf32>
    tpu.vector_store %arg5[%c0_20, %c0_21, %c0_22], %31 {strides = array<i32>} : memref<1x8x128xf32, #tpu.memory_space<vmem>>, vector<1x8x128xf32>,
    return
  }
  func.func @transform_0(%arg0: i32, %arg1: i32) -> (i32, i32, i32) {
    %c0_i32 = arith.constant 0 : i32
    %c0_i32_0 = arith.constant 0 : i32
    return %arg0, %arg1, %c0_i32 : i32, i32, i32
  }
  func.func @transform_1(%arg0: i32, %arg1: i32) -> (i32, i32, i32) {
    %c0_i32 = arith.constant 0 : i32
    %c0_i32_0 = arith.constant 0 : i32
    return %arg0, %arg1, %c0_i32 : i32, i32, i32
  }
  func.func @transform_2(%arg0: i32, %arg1: i32) -> (i32, i32, i32) {
    %c0_i32 = arith.constant 0 : i32
    %c0_i32_0 = arith.constant 0 : i32
    %c0_i32_1 = arith.constant 0 : i32
    return %arg0, %c0_i32, %c0_i32_0 : i32, i32, i32
  }
  func.func @transform_3(%arg0: i32, %arg1: i32) -> (i32, i32, i32) {
    %c0_i32 = arith.constant 0 : i32
    %c0_i32_0 = arith.constant 0 : i32
    %c0_i32_1 = arith.constant 0 : i32
    return %arg0, %c0_i32, %c0_i32_0 : i32, i32, i32
  }
}

</mosaic_0001>

<bundles_post_ra>
// kernel: tpu_custom_call.1
= control target key start
LH: loop header
LB: loop body
LE: loop exit
PB: predicated region body
PF: predicated region fallthrough
CT: control target
= control target key end

     0   :  { %9 = vsyncpa [#allocation3], 0  ;;  %s1683_s0 = inlined_call_operand.hbm [shape: f32[2,272,128], index: 0, kind: input, shape index: {}]   ;;  %s1684_s1 = inlined_call_operand.hbm [shape: f32[2,272,128], index: 1, kind: input, shape index: {}]   ;;  %s1685_s2 = inlined_call_operand.hbm [shape: f32[2,8,128], index: 2, kind: output, shape index: {0}]   ;;  %s1686_s3 = inlined_call_operand.hbm [shape: f32[2,8,128], index: 3, kind: output, shape index: {1}]  }
   0x1   :  { %11 = vsyncpa [#allocation3 + $0x1], 0 }
   0x2   :  { %12 = vsyncpa [#allocation6], 0 }
   0x3   :  { %14 = vsyncpa [#allocation6 + $0x1], 0 }
   0x4   :  { %15 = vsyncpa [#allocation4], 0 }
   0x5   :  { %17 = vsyncpa [#allocation4 + $0x1], 0 }
   0x6   :  { %18 = vsyncpa [#allocation9], 0 }
   0x7   :  { %20 = vsyncpa [#allocation9 + $0x1], 0  ;;  %s1051_s12 = smov 0   ;;  %s1053_s13 = smov 0  }
   0x8   :  { %s1055_s14 = smov 0   ;;  %s1057_s15 = smov 0  }
   0x9   :  { %s1059_s16 = smov 0   ;;  %s1061_s17 = smov 0  }
   0xa LB: > { %s749_s18 = sadd.s32 4294967295, %s1022_s17   ;;  %s750_s19 = sadd.s32 4294967294, %s1022_s17   ;;  %s1022_s17 = sphi %s1061_s17, %s26_s17   ;;  %s1018_s16 = sphi %s1059_s16, %s1704_s16   ;;  %s1014_s15 = sphi %s1057_s15, %s1703_s15   ;;  %s1010_s14 = sphi %s1055_s14, %s1702_s14   ;;  %s1006_s13 = sphi %s1053_s13, %s1701_s13   ;;  %s1002_s12 = sphi %s1051_s12, %s1700_s12  }
   0xb   : > { %s38_s20 = sadd.s32 1, %s1018_s16  ;;  %s47_s21 = sadd.s32 1, %s1010_s14 }
   0xc   : > { %p40_p0 = scmp.ge.s32.totalorder %s38_s20, 2  ;;  %p54_p1 = scmp.ne.s32.totalorder %s1010_s14, %s1006_s13 }
   0xd   : > { %p55_p2 = scmp.eq.s32.totalorder %s1022_s17, 0  ;;  %p60_p3 = scmp.ne.s32.totalorder %s1006_s13, %s1002_s12 }
   0xe   : > { %s1706_s20 = smov (%p40_p0, %s38_s20), 0  ;;  %p61_p5 = scmp.eq.s32.totalorder %s749_s18, 0 }
   0xf   : > { %p1092_p4 = por %p55_p2, %p54_p1  ;;  %s42_s23 = ssub.s32 %s1018_s16, %s1706_s20 }
  0x10   : > { %p112_p6 = scmp.eq.s32.totalorder %s749_s18, 1  ;;  %p45_p7 = scmp.eq.s32.totalorder %s42_s23, 0 }
  0x11   : > { %p1098_p8 = por %p61_p5, %p60_p3  ;;  %p118_p10 = scmp.eq.s32.totalorder %s750_s19, 1 }
  0x12   : > { %p1102_p9 = por %p112_p6, %p54_p1  ;;  %p791_p13 = scmp.lt.s32.totalorder %s1022_s17, 2 }
  0x13   : > { %s1690_s24 = scalar_select %p1098_p8, 1, 0 }
  0x14   : > { %s1691_s25 = scalar_select %p1102_p9, 1, 0 }
  0x15   : > { %s1107_s26 = scalar_select %p45_p7, %s1010_s14, %s47_s21  }
  0x16   : > { %p1109_p11 = por %p118_p10, %p60_p3  ;;  %s1116_s28 = sand.u32 1, %s1010_s14  }
  0x17   : > { %s764_s29 = smul.u32 272, %s1116_s28  ;;  %p1122_p0 = pnand %p791_p13, %p1092_p4 }
  0x18   : > { %s1692_s27 = scalar_select %p1109_p11, 1, 0 }
  0x19   : > { %s765_s30 = smul.u32 4352, %s1018_s16  ;;  %s168_s8 = scalar_lea.vmem [#allocation2], %s764_s29 }
  0x1a   : > { %s177_s9 = sshll.u32 %s168_s8, 4  ;;  %s165_s10 = scalar_lea.sflag [#allocation3], %s1116_s28  ;;  %s1135_s9 = int_to_ptr.vmem [resolvable:$true] %s177_s9 }
  0x1b   : > { %s1131_s7 = scalar_lea.hbm %s1683_s0, %s765_s30  ;;  %p846_p3 = pneg %p1122_p0 }
  0x1c   : > { %s844_s11 = scalar_lea.hbm %s1131_s7, 4352  ;;  %s849_s21 = scalar_lea.hbm %s1683_s0, 8704 }
  0x1d   : > { %p845_p2 = scmp.ne.s32.totalorder %s1131_s7, %s844_s11  ;;  %p850_p6 = scmp.lt.u32.totalorder %s1131_s7, %s1683_s0 }
  0x1e   : > { %p851_p7 = scmp.lt.u32.totalorder %s849_s21, %s844_s11  ;;  %p853_p13 = scmp.lt.u32.totalorder %s844_s11, %s1131_s7 }
  0x1f   : > { %p847_p4 = pnand %p846_p3, %p845_p2 }
  0x20   : > { %p852_p10 = por %p851_p7, %p850_p6 }
  0x21   : > { %p848_p5 = pneg %p847_p4 }
  0x22   : > { %p854_p12 = por %p853_p13, %p852_p10 }
  0x24   : > { %p855_p1 = pnand %p854_p12, %p848_p5 }
  0x26   : > { %858 = shalt.err (!%p855_p1)
}
  0x27   : > { %s859_s5 = scalar_lea.vmem %s1135_s9, 4352  ;;  %s1024_s6 = smov [#allocation2]  }
  0x28   : > { %p860_p2 = scmp.ne.s32.totalorder %s1135_s9, %s859_s5  ;;  %s864_s8 = sshll.u32 %s1024_s6, 4  ;;  %s865_s8 = int_to_ptr.vmem [resolvable:$false] %s864_s8 }
  0x29   : > { %s866_s18 = scalar_lea.vmem %s865_s8, 8704  ;;  %p867_p9 = scmp.lt.s32.totalorder %s1135_s9, %s865_s8 }
  0x2a   : > { %p862_p4 = pnand %p860_p2, %p846_p3  ;;  %p868_p6 = scmp.lt.s32.totalorder %s866_s18, %s859_s5 }
  0x2c   : > { %p863_p11 = pneg %p862_p4  ;;  %p869_p7 = por %p868_p6, %p867_p9 }
  0x2e   : > { %p870_p10 = pnand %p869_p7, %p863_p11 }
  0x30   : > { %873 = shalt.err (!%p870_p10)
}
  0x31   : > { %s1025_s11 = smov 128   ;;  %s1026_s19 = smov 8  }
  0x32   : > { %780 = dma.hbm_to_vmem [thread:$0]  (!%p1122_p0), %s1131_s7, 4352, %s1135_s9, %s165_s10, %s1025_s11, %s1025_s11, %s1026_s19  }
  0x33   : > { %p208_p9 = scmp.lt.s32.totalorder %s1022_s17, 3  ;;  %s1175_s23 = scalar_lea.hbm %s1684_s1, %s765_s30 }
  0x34   : > { %p1694_p11 = scmp.ge.s32.totalorder %s1022_s17, 1  ;;  %s191_s6 = scalar_lea.vmem [#allocation5], %s764_s29 }
  0x35   : > { %s200_s8 = sshll.u32 %s191_s6, 4  ;;  %s188_s7 = scalar_lea.sflag [#allocation6], %s1116_s28  ;;  %s1185_s8 = int_to_ptr.vmem [resolvable:$true] %s200_s8 }
  0x36   : > { %p1179_p12 = pnand %p1694_p11, %p208_p9  ;;  %s874_s9 = scalar_lea.hbm %s1175_s23, 4352 }
  0x37   : > { %p875_p1 = scmp.ne.s32.totalorder %s1175_s23, %s874_s9  ;;  %s879_s18 = scalar_lea.hbm %s1684_s1, 8704 }
  0x38   : > { %p880_p2 = scmp.lt.u32.totalorder %s1175_s23, %s1684_s1  ;;  %p881_p4 = scmp.lt.u32.totalorder %s879_s18, %s874_s9 }
  0x39   : > { %p877_p5 = pnand %p875_p1, %p846_p3  ;;  %p883_p7 = scmp.lt.u32.totalorder %s874_s9, %s1175_s23 }
  0x3a   : > { %p882_p6 = por %p881_p4, %p880_p2 }
  0x3b   : > { %p878_p13 = pneg %p877_p5 }
  0x3c   : > { %p884_p10 = por %p883_p7, %p882_p6 }
  0x3e   : > { %p885_p9 = pnand %p884_p10, %p878_p13 }
  0x40   : > { %888 = shalt.err (!%p885_p9)
}
  0x41   : > { %s889_s29 = scalar_lea.vmem %s1185_s8, 4352  ;;  %s1027_s6 = smov [#allocation5]  }
  0x42   : > { %p890_p11 = scmp.ne.s32.totalorder %s1185_s8, %s889_s29  ;;  %s894_s30 = sshll.u32 %s1027_s6, 4  ;;  %s895_s30 = int_to_ptr.vmem [resolvable:$false] %s894_s30 }
  0x43   : > { %s896_s10 = scalar_lea.vmem %s895_s30, 8704  ;;  %p897_p8 = scmp.lt.s32.totalorder %s1185_s8, %s895_s30 }
  0x44   : > { %p892_p1 = pnand %p890_p11, %p846_p3  ;;  %p898_p2 = scmp.lt.s32.totalorder %s896_s10, %s889_s29 }
  0x46   : > { %p893_p5 = pneg %p892_p1  ;;  %p899_p4 = por %p898_p2, %p897_p8 }
  0x48   : > { %p900_p6 = pnand %p899_p4, %p893_p5 }
  0x4a   : > { %903 = shalt.err (!%p900_p6)
}
  0x4b   : > { %783 = dma.hbm_to_vmem [thread:$0]  (!%p1122_p0), %s1175_s23, 4352, %s1185_s8, %s188_s7, %s1025_s11, %s1025_s11, %s1026_s19  }
  0x4c   : > { %212 = sbr.rel (%p1179_p12) target bundleno = 197 (0xc5), region = 28  ;;  %s1219_s9 = sand.u32 (!%p1179_p12), 1, %s1006_s13  }
  0x4d   : > { %s768_s18 = smul.u32 (!%p1179_p12), 272, %s1219_s9  ;;  %s215_s21 = scalar_lea.sflag (!%p1179_p12), [#allocation3], %s1219_s9 }
  0x4e   : > { %p1696_p8 = scmp.ne.s32.totalorder (!%p1179_p12), %s1690_s24, 0 }
  0x4f   : > { %s1223_s4 = scalar_lea.vmem (!%p1179_p12), [#allocation2], %s768_s18 }
  0x53   : > { %985 = dma.done.wait (%p1696_p8), %s215_s21, 4352  }
  0x54   : > { %987 = vsyncadd (%p1696_p8), %s215_s21, 4294962944  ;;  %s224_s28 = scalar_lea.sflag [#allocation6], %s1219_s9  ;;  %s1230_s11 = scalar_lea.vmem [#allocation5], %s768_s18 }
  0x55   : > { %989 = dma.done.wait (%p1696_p8), %s224_s28, 4352  }
  0x56   : > { %991 = vsyncadd (%p1696_p8), %s224_s28, 4294962944  ;;  %v268_v0 = vld [vmem:[%s1223_s4] sm:$0xff]  ;;  %v269_v1 = vld [vmem:[%s1223_s4 + $0x8] sm:$0xff]  ;;  %v1028_v52 = vmov 0.0   ;;  %s756_s24 = sshll.u32 %s1219_s9, 3  ;;  %s760_s19 = sshll.u32 %s1014_s15, 7 }
  0x57   : > { %v302_v2 = vld [vmem:[%s1230_s11] sm:$0xff]  ;;  %v303_v3 = vld [vmem:[%s1230_s11 + $0x8] sm:$0xff]  ;;  %v270_v4 = vld [vmem:[%s1223_s4 + $0x10] sm:$0xff]  ;;  %s252_s23 = scalar_lea.vmem [#allocation7], %s756_s24  ;;  %s1596_s22 = scalar_lea.hbm %s1685_s2, %s760_s19 }
  0x58   : > { %v1242_v5 = vld [vmem:[%s1230_s11 + $0x10] sm:$0xff]  ;;  %v370_v6 = vsub.f32 %v268_v0, %v302_v2  ;;  %v371_v7 = vsub.f32 %v269_v1, %v303_v3  ;;  %v271_v8 = vld [vmem:[%s1223_s4 + $0x18] sm:$0xff]  ;;  %v272_v11 = vld [vmem:[%s1223_s4 + $0x20] sm:$0xff]  ;;  %vm336_vm0 = vcmp.ne.f32.partialorder %v302_v2, -1.0  ;;  %vm337_vm1 = vcmp.ne.f32.partialorder %v303_v3, -1.0  ;;  %s597_s5 = sshll.u32 %s252_s23, 4  ;;  %s1598_s5 = int_to_ptr.vmem [resolvable:$true] %s597_s5 }
  0x59   : > { %v1246_v9 = vld [vmem:[%s1230_s11 + $0x18] sm:$0xff]  ;;  %v372_v10 = vsub.f32 %v270_v4, %v1242_v5  ;;  %v1251_v12 = vld [vmem:[%s1230_s11 + $0x20] sm:$0xff]  ;;  %v273_v16 = vld [vmem:[%s1223_s4 + $0x28] sm:$0xff]  ;;  %vm338_vm2 = vcmp.ne.f32.partialorder %v1242_v5, -1.0  ;;  %v472_v53 = vsel %vm336_vm0, 1.0, %v1028_v52  ;;  %v473_v54 = vsel %vm337_vm1, 1.0, %v1028_v52 }
  0x5a   : > { %v373_v13 = vsub.f32 %v271_v8, %v1246_v9  ;;  %v404_v14 = vmul.f32 %v370_v6, %v370_v6  ;;  %v405_v15 = vmul.f32 %v371_v7, %v371_v7  ;;  %v1256_v17 = vld [vmem:[%s1230_s11 + $0x28] sm:$0xff]  ;;  %v374_v18 = vsub.f32 %v272_v11, %v1251_v12  ;;  %v274_v20 = vld [vmem:[%s1223_s4 + $0x30] sm:$0xff]  ;;  %v275_v26 = vld [vmem:[%s1223_s4 + $0x38] sm:$0xff]  ;;  %s579_s29 = scalar_lea.sflag [#allocation4], %s1219_s9  ;;  %s904_s6 = scalar_lea.vmem %s1598_s5, 128 }
  0x5b   : > { %v406_v19 = vmul.f32 %v372_v10, %v372_v10  ;;  %v1261_v21 = vld [vmem:[%s1230_s11 + $0x30] sm:$0xff]  ;;  %v375_v22 = vsub.f32 %v273_v16, %v1256_v17  ;;  %v1269_v27 = vld [vmem:[%s1230_s11 + $0x38] sm:$0xff]  ;;  %vm339_vm3 = vcmp.ne.f32.partialorder %v1246_v9, -1.0  ;;  %v276_v31 = vld [vmem:[%s1223_s4 + $0x40] sm:$0xff]  ;;  %vm340_vm4 = vcmp.ne.f32.partialorder %v1251_v12, -1.0  ;;  %p905_p0 = scmp.ne.s32.totalorder %s1598_s5, %s904_s6  ;;  %p1697_p3 = scmp.ne.s32.totalorder %s1691_s25, 0 }
  0x5c   : > { %v407_v23 = vmul.f32 %v373_v13, %v373_v13  ;;  %v438_v24 = vsel %vm336_vm0, %v404_v14, 0.0  ;;  %v439_v25 = vsel %vm337_vm1, %v405_v15, 0.0  ;;  %v376_v28 = vsub.f32 %v274_v20, %v1261_v21  ;;  %v1277_v32 = vld [vmem:[%s1230_s11 + $0x40] sm:$0xff]  ;;  %v277_v37 = vld [vmem:[%s1223_s4 + $0x48] sm:$0xff]  ;;  %v278_v43 = vld [vmem:[%s1223_s4 + $0x50] sm:$0xff]  ;;  %s1029_s30 = smov [#allocation7]  }
  0x5d   : > { %v408_v29 = vmul.f32 %v374_v18, %v374_v18  ;;  %v440_v30 = vsel %vm338_vm2, %v406_v19, 0.0  ;;  %v507_v33 = vadd.f32 %v439_v25, %v438_v24  ;;  %v377_v34 = vsub.f32 %v275_v26, %v1269_v27  ;;  %v1285_v38 = vld [vmem:[%s1230_s11 + $0x48] sm:$0xff]  ;;  %v1293_v44 = vld [vmem:[%s1230_s11 + $0x50] sm:$0xff]  ;;  %v279_v49 = vld [vmem:[%s1223_s4 + $0x58] sm:$0xff]  ;;  %p906_p12 = pnand %p905_p0, %p1697_p3  ;;  %s908_s10 = sshll.u32 %s1029_s30, 4  ;;  %s909_s10 = int_to_ptr.vmem [resolvable:$false] %s908_s10 }
  0x5e   : > { %v409_v35 = vmul.f32 %v375_v22, %v375_v22  ;;  %v441_v36 = vsel %vm339_vm3, %v407_v23, 0.0  ;;  %vm341_vm5 = vcmp.ne.f32.partialorder %v1256_v17, -1.0  ;;  %v378_v40 = vsub.f32 %v276_v31, %v1277_v32  ;;  %v1301_v50 = vld [vmem:[%s1230_s11 + $0x58] sm:$0xff]  ;;  %v280_v58 = vld [vmem:[%s1223_s4 + $0x60] sm:$0xff]  ;;  %v281_v2 = vld [vmem:[%s1223_s4 + $0x68] sm:$0xff]  ;;  %s910_s18 = scalar_lea.vmem %s909_s10, 256  ;;  %p911_p7 = scmp.lt.s32.totalorder %s1598_s5, %s909_s10 }
  0x5f   : > { %v508_v39 = vadd.f32 %v507_v33, %v440_v30  ;;  %v410_v41 = vmul.f32 %v376_v28, %v376_v28  ;;  %v442_v42 = vsel %vm340_vm4, %v408_v29, 0.0  ;;  %vm342_vm6 = vcmp.ne.f32.partialorder %v1261_v21, -1.0  ;;  %v1313_v59 = vld [vmem:[%s1230_s11 + $0x60] sm:$0xff]  ;;  %v1324_v3 = vld [vmem:[%s1230_s11 + $0x68] sm:$0xff]  ;;  %v282_v11 = vld [vmem:[%s1223_s4 + $0x70] sm:$0xff]  ;;  %p907_p13 = pneg %p906_p12  ;;  %p912_p10 = scmp.lt.s32.totalorder %s910_s18, %s904_s6 }
  0x60   : > { %v379_v46 = vsub.f32 %v277_v37, %v1285_v38  ;;  %v411_v47 = vmul.f32 %v377_v34, %v377_v34  ;;  %v443_v48 = vsel %vm341_vm5, %v409_v35, 0.0  ;;  %vm343_vm7 = vcmp.ne.f32.partialorder %v1269_v27, -1.0  ;;  %v1335_v13 = vld [vmem:[%s1230_s11 + $0x70] sm:$0xff]  ;;  %v283_v20 = vld [vmem:[%s1223_s4 + $0x78] sm:$0xff]  ;;  %v284_v29 = vld [vmem:[%s1223_s4 + $0x80] sm:$0xff] }
  0x61   : > { %v509_v45 = vadd.f32 %v508_v39, %v441_v36  ;;  %v380_v55 = vsub.f32 %v278_v43, %v1293_v44  ;;  %v412_v56 = vmul.f32 %v378_v40, %v378_v40  ;;  %v444_v57 = vsel %vm342_vm6, %v410_v41, 0.0  ;;  %v1346_v22 = vld [vmem:[%s1230_s11 + $0x78] sm:$0xff]  ;;  %v1357_v30 = vld [vmem:[%s1230_s11 + $0x80] sm:$0xff]  ;;  %v285_v37 = vld [vmem:[%s1223_s4 + $0x88] sm:$0xff]  ;;  %p913_p9 = por %p912_p10, %p911_p7 }
  0x62   : > { %vm344_vm8 = vcmp.ne.f32.partialorder %v1277_v32, -1.0  ;;  %v474_v61 = vsel %vm338_vm2, 1.0, %v1028_v52  ;;  %v381_v62 = vsub.f32 %v279_v49, %v1301_v50  ;;  %v413_v63 = vmul.f32 %v379_v46, %v379_v46  ;;  %v1368_v39 = vld [vmem:[%s1230_s11 + $0x88] sm:$0xff]  ;;  %v286_v46 = vld [vmem:[%s1223_s4 + $0x90] sm:$0xff] }
  0x63   : > { %v510_v51 = vadd.f32 %v509_v45, %v442_v42  ;;  %v445_v0 = vsel %vm343_vm7, %v411_v47, 0.0  ;;  %v543_v1 = vadd.f32 %v473_v54, %v472_v53  ;;  %vm345_vm9 = vcmp.ne.f32.partialorder %v1285_v38, -1.0  ;;  %v1379_v47 = vld [vmem:[%s1230_s11 + $0x90] sm:$0xff]  ;;  %p914_p11 = pnand %p913_p9, %p907_p13 }
  0x64   : > { %v475_v5 = vsel %vm339_vm3, 1.0, %v1028_v52  ;;  %v382_v6 = vsub.f32 %v280_v58, %v1313_v59  ;;  %v414_v7 = vmul.f32 %v380_v55, %v380_v55  ;;  %v446_v8 = vsel %vm344_vm8, %v412_v56, 0.0  ;;  %v287_v55 = vld [vmem:[%s1223_s4 + $0x98] sm:$0xff] }
  0x65   : > { %v511_v60 = vadd.f32 %v510_v51, %v443_v48  ;;  %v544_v10 = vadd.f32 %v543_v1, %v474_v61  ;;  %vm346_vm10 = vcmp.ne.f32.partialorder %v1293_v44, -1.0  ;;  %v476_v9 = vsel %vm340_vm4, 1.0, %v1028_v52  ;;  %v1390_v56 = vld [vmem:[%s1230_s11 + $0x98] sm:$0xff] }
  0x66   : > { %v383_v15 = vsub.f32 %v281_v2, %v1324_v3  ;;  %v415_v16 = vmul.f32 %v381_v62, %v381_v62  ;;  %v447_v18 = vsel %vm345_vm9, %v413_v63, 0.0  ;;  %vm347_vm11 = vcmp.ne.f32.partialorder %v1301_v50, -1.0  ;;  %v288_v63 = vld [vmem:[%s1223_s4 + $0xa0] sm:$0xff] }
  0x67   : > { %v512_v4 = vadd.f32 %v511_v60, %v444_v57  ;;  %v545_v19 = vadd.f32 %v544_v10, %v475_v5  ;;  %v477_v12 = vsel %vm341_vm5, 1.0, %v1028_v52  ;;  %v384_v24 = vsub.f32 %v282_v11, %v1335_v13 }
  0x68   : > { %v416_v25 = vmul.f32 %v382_v6, %v382_v6  ;;  %v448_v26 = vsel %vm346_vm10, %v414_v7, 0.0  ;;  %vm348_vm12 = vcmp.ne.f32.partialorder %v1313_v59, -1.0  ;;  %v478_v17 = vsel %vm342_vm6, 1.0, %v1028_v52  ;;  %v289_v7 = vld [vmem:[%s1223_s4 + $0xa8] sm:$0xff] }
  0x69   : > { %v513_v14 = vadd.f32 %v512_v4, %v445_v0  ;;  %v546_v28 = vadd.f32 %v545_v19, %v476_v9  ;;  %v385_v33 = vsub.f32 %v283_v20, %v1346_v22  ;;  %v417_v34 = vmul.f32 %v383_v15, %v383_v15  ;;  %v1401_v0 = vld [vmem:[%s1230_s11 + $0xa0] sm:$0xff] }
  0x6a   : > { %v449_v35 = vsel %vm347_vm11, %v415_v16, 0.0  ;;  %vm349_vm13 = vcmp.ne.f32.partialorder %v1324_v3, -1.0  ;;  %v479_v21 = vsel %vm343_vm7, 1.0, %v1028_v52  ;;  %v386_v41 = vsub.f32 %v284_v29, %v1357_v30  ;;  %v290_v16 = vld [vmem:[%s1223_s4 + $0xb0] sm:$0xff] }
  0x6b   : > { %v514_v23 = vadd.f32 %v513_v14, %v446_v8  ;;  %v547_v36 = vadd.f32 %v546_v28, %v477_v12  ;;  %v418_v42 = vmul.f32 %v384_v24, %v384_v24  ;;  %v450_v43 = vsel %vm348_vm12, %v416_v25, 0.0  ;;  %v1412_v8 = vld [vmem:[%s1230_s11 + $0xa8] sm:$0xff]  ;;  %v291_v25 = vld [vmem:[%s1223_s4 + $0xb8] sm:$0xff] }
  0x6c   : > { %vm350_vm14 = vcmp.ne.f32.partialorder %v1335_v13, -1.0  ;;  %v480_v27 = vsel %vm344_vm8, 1.0, %v1028_v52  ;;  %v387_v49 = vsub.f32 %v285_v37, %v1368_v39  ;;  %v419_v51 = vmul.f32 %v385_v33, %v385_v33 }
  0x6d   : > { %v515_v31 = vadd.f32 %v514_v23, %v447_v18  ;;  %v548_v45 = vadd.f32 %v547_v36, %v478_v17  ;;  %v451_v53 = vsel %vm349_vm13, %v417_v34, 0.0  ;;  %vm351_vm15 = vcmp.ne.f32.partialorder %v1346_v22, -1.0  ;;  %v1423_v18 = vld [vmem:[%s1230_s11 + $0xb0] sm:$0xff]  ;;  %v292_v34 = vld [vmem:[%s1223_s4 + $0xc0] sm:$0xff] }
  0x6e   : > { %v481_v32 = vsel %vm345_vm9, 1.0, %v1028_v52  ;;  %v388_v58 = vsub.f32 %v286_v46, %v1379_v47  ;;  %v420_v60 = vmul.f32 %v386_v41, %v386_v41  ;;  %v452_v61 = vsel %vm350_vm14, %v418_v42, 0.0  ;;  %v293_v42 = vld [vmem:[%s1223_s4 + $0xc8] sm:$0xff] }
  0x6f   : > { %v516_v40 = vadd.f32 %v515_v31, %v448_v26  ;;  %v549_v54 = vadd.f32 %v548_v45, %v479_v21  ;;  %vm352_vm0 = vcmp.ne.f32.partialorder %v1357_v30, -1.0  ;;  %v482_v38 = vsel %vm346_vm10, 1.0, %v1028_v52  ;;  %v1434_v26 = vld [vmem:[%s1230_s11 + $0xb8] sm:$0xff] }
  0x70   : > { %v389_v2 = vsub.f32 %v287_v55, %v1390_v56  ;;  %v421_v4 = vmul.f32 %v387_v49, %v387_v49  ;;  %v453_v5 = vsel %vm351_vm15, %v419_v51, 0.0  ;;  %vm353_vm1 = vcmp.ne.f32.partialorder %v1368_v39, -1.0  ;;  %v294_v51 = vld [vmem:[%s1223_s4 + $0xd0] sm:$0xff] }
  0x71   : > { %v517_v48 = vadd.f32 %v516_v40, %v449_v35  ;;  %v550_v62 = vadd.f32 %v549_v54, %v480_v27  ;;  %v483_v44 = vsel %vm347_vm11, 1.0, %v1028_v52  ;;  %v390_v11 = vsub.f32 %v288_v63, %v1401_v0  ;;  %v1445_v35 = vld [vmem:[%s1230_s11 + $0xc0] sm:$0xff] }
  0x72   : > { %v422_v14 = vmul.f32 %v388_v58, %v388_v58  ;;  %v454_v9 = vsel %vm352_vm0, %v420_v60, 0.0  ;;  %vm354_vm2 = vcmp.ne.f32.partialorder %v1379_v47, -1.0  ;;  %v484_v50 = vsel %vm348_vm12, 1.0, %v1028_v52  ;;  %v295_v60 = vld [vmem:[%s1223_s4 + $0xd8] sm:$0xff] }
  0x73   : > { %v518_v57 = vadd.f32 %v517_v48, %v450_v43  ;;  %v551_v6 = vadd.f32 %v550_v62, %v481_v32  ;;  %v391_v20 = vsub.f32 %v289_v7, %v1412_v8  ;;  %v423_v23 = vmul.f32 %v389_v2, %v389_v2  ;;  %v1456_v43 = vld [vmem:[%s1230_s11 + $0xc8] sm:$0xff] }
  0x74   : > { %v455_v12 = vsel %vm353_vm1, %v421_v4, 0.0  ;;  %vm355_vm3 = vcmp.ne.f32.partialorder %v1390_v56, -1.0  ;;  %v485_v59 = vsel %vm349_vm13, 1.0, %v1028_v52  ;;  %v392_v29 = vsub.f32 %v290_v16, %v1423_v18  ;;  %v296_v4 = vld [vmem:[%s1223_s4 + $0xe0] sm:$0xff] }
  0x75   : > { %v519_v1 = vadd.f32 %v518_v57, %v451_v53  ;;  %v552_v15 = vadd.f32 %v551_v6, %v482_v38  ;;  %v424_v31 = vmul.f32 %v390_v11, %v390_v11  ;;  %v456_v17 = vsel %vm354_vm2, %v422_v14, 0.0  ;;  %v1467_v53 = vld [vmem:[%s1230_s11 + $0xd0] sm:$0xff]  ;;  %v297_v14 = vld [vmem:[%s1223_s4 + $0xe8] sm:$0xff] }
  0x76   : > { %vm356_vm4 = vcmp.ne.f32.partialorder %v1401_v0, -1.0  ;;  %v486_v3 = vsel %vm350_vm14, 1.0, %v1028_v52  ;;  %v393_v37 = vsub.f32 %v291_v25, %v1434_v26  ;;  %v425_v40 = vmul.f32 %v391_v20, %v391_v20 }
  0x77   : > { %v520_v10 = vadd.f32 %v519_v1, %v452_v61  ;;  %v553_v24 = vadd.f32 %v552_v15, %v483_v44  ;;  %v457_v21 = vsel %vm355_vm3, %v423_v23, 0.0  ;;  %vm357_vm5 = vcmp.ne.f32.partialorder %v1412_v8, -1.0  ;;  %v1478_v61 = vld [vmem:[%s1230_s11 + $0xd8] sm:$0xff]  ;;  %v298_v23 = vld [vmem:[%s1223_s4 + $0xf0] sm:$0xff] }
  0x78   : > { %v487_v13 = vsel %vm351_vm15, 1.0, %v1028_v52  ;;  %v394_v46 = vsub.f32 %v292_v34, %v1445_v35  ;;  %v426_v48 = vmul.f32 %v392_v29, %v392_v29  ;;  %v458_v27 = vsel %vm356_vm4, %v424_v31, 0.0  ;;  %v299_v31 = vld [vmem:[%s1223_s4 + $0xf8] sm:$0xff] }
  0x79   : > { %v521_v19 = vadd.f32 %v520_v10, %v453_v5  ;;  %v554_v33 = vadd.f32 %v553_v24, %v484_v50  ;;  %vm358_vm6 = vcmp.ne.f32.partialorder %v1423_v18, -1.0  ;;  %v488_v22 = vsel %vm352_vm0, 1.0, %v1028_v52  ;;  %v1489_v5 = vld [vmem:[%s1230_s11 + $0xe0] sm:$0xff] }
  0x7a   : > { %v395_v55 = vsub.f32 %v293_v42, %v1456_v43  ;;  %v427_v57 = vmul.f32 %v393_v37, %v393_v37  ;;  %v459_v32 = vsel %vm357_vm5, %v425_v40, 0.0  ;;  %vm359_vm7 = vcmp.ne.f32.partialorder %v1434_v26, -1.0  ;;  %v300_v40 = vld [vmem:[%s1223_s4 + $0x100] sm:$0xff] }
  0x7b   : > { %v522_v28 = vadd.f32 %v521_v19, %v454_v9  ;;  %v555_v41 = vadd.f32 %v554_v33, %v485_v59  ;;  %v489_v30 = vsel %vm353_vm1, 1.0, %v1028_v52  ;;  %v396_v63 = vsub.f32 %v294_v51, %v1467_v53  ;;  %v1500_v9 = vld [vmem:[%s1230_s11 + $0xe8] sm:$0xff] }
  0x7c   : > { %v428_v1 = vmul.f32 %v394_v46, %v394_v46  ;;  %v460_v38 = vsel %vm358_vm6, %v426_v48, 0.0  ;;  %vm360_vm8 = vcmp.ne.f32.partialorder %v1445_v35, -1.0  ;;  %v490_v39 = vsel %vm354_vm2, 1.0, %v1028_v52  ;;  %v301_v48 = vld [vmem:[%s1223_s4 + $0x108] sm:$0xff] }
  0x7d   : > { %v523_v36 = vadd.f32 %v522_v28, %v455_v12  ;;  %v556_v49 = vadd.f32 %v555_v41, %v486_v3  ;;  %v397_v7 = vsub.f32 %v295_v60, %v1478_v61  ;;  %v429_v10 = vmul.f32 %v395_v55, %v395_v55  ;;  %v1511_v12 = vld [vmem:[%s1230_s11 + $0xf0] sm:$0xff] }
  0x7e   : > { %v461_v44 = vsel %vm359_vm7, %v427_v57, 0.0  ;;  %vm361_vm9 = vcmp.ne.f32.partialorder %v1456_v43, -1.0  ;;  %v491_v47 = vsel %vm355_vm3, 1.0, %v1028_v52  ;;  %v398_v16 = vsub.f32 %v296_v4, %v1489_v5 }
  0x7f   : > { %v524_v45 = vadd.f32 %v523_v36, %v456_v17  ;;  %v557_v58 = vadd.f32 %v556_v49, %v487_v13  ;;  %v430_v19 = vmul.f32 %v396_v63, %v396_v63  ;;  %v462_v50 = vsel %vm360_vm8, %v428_v1, 0.0  ;;  %v1522_v17 = vld [vmem:[%s1230_s11 + $0xf8] sm:$0xff] }
  0x80   : > { %vm362_vm10 = vcmp.ne.f32.partialorder %v1467_v53, -1.0  ;;  %v492_v56 = vsel %vm356_vm4, 1.0, %v1028_v52  ;;  %v399_v25 = vsub.f32 %v297_v14, %v1500_v9  ;;  %v431_v28 = vmul.f32 %v397_v7, %v397_v7 }
  0x81   : > { %v525_v54 = vadd.f32 %v524_v45, %v457_v21  ;;  %v558_v2 = vadd.f32 %v557_v58, %v488_v22  ;;  %v463_v59 = vsel %vm361_vm9, %v429_v10, 0.0  ;;  %vm363_vm11 = vcmp.ne.f32.partialorder %v1478_v61, -1.0  ;;  %v334_v21 = vld [vmem:[%s1230_s11 + $0x100] sm:$0xff] }
  0x82   : > { %v493_v0 = vsel %vm357_vm5, 1.0, %v1028_v52  ;;  %v400_v34 = vsub.f32 %v298_v23, %v1511_v12  ;;  %v432_v36 = vmul.f32 %v398_v16, %v398_v16  ;;  %v464_v3 = vsel %vm362_vm10, %v430_v19, 0.0 }
  0x83   : > { %v526_v62 = vadd.f32 %v525_v54, %v458_v27  ;;  %v559_v11 = vadd.f32 %v558_v2, %v489_v30  ;;  %vm364_vm12 = vcmp.ne.f32.partialorder %v1489_v5, -1.0  ;;  %v494_v42 = vsel %vm358_vm6, 1.0, %v1028_v52  ;;  %v1542_v27 = vld [vmem:[%s1230_s11 + $0x108] sm:$0xff] }
  0x84   : > { %v401_v8 = vsub.f32 %v299_v31, %v1522_v17  ;;  %v433_v45 = vmul.f32 %v399_v25, %v399_v25  ;;  %v465_v13 = vsel %vm363_vm11, %v431_v28, 0.0  ;;  %vm365_vm13 = vcmp.ne.f32.partialorder %v1500_v9, -1.0 }
  0x85   : > { %v527_v6 = vadd.f32 %v526_v62, %v459_v32  ;;  %v560_v20 = vadd.f32 %v559_v11, %v490_v39  ;;  %v495_v51 = vsel %vm359_vm7, 1.0, %v1028_v52  ;;  %v402_v54 = vsub.f32 %v300_v40, %v334_v21 }
  0x86   : > { %v434_v18 = vmul.f32 %v400_v34, %v400_v34  ;;  %v466_v22 = vsel %vm364_vm12, %v432_v36, 0.0  ;;  %vm366_vm14 = vcmp.ne.f32.partialorder %v1511_v12, -1.0  ;;  %v496_v32 = vsel %vm360_vm8, 1.0, %v1028_v52 }
  0x87   : > { %v528_v15 = vadd.f32 %v527_v6, %v460_v38  ;;  %v561_v29 = vadd.f32 %v560_v20, %v491_v47  ;;  %v403_v58 = vsub.f32 %v301_v48, %v1542_v27  ;;  %v435_v60 = vmul.f32 %v401_v8, %v401_v8 }
  0x88   : > { %v467_v26 = vsel %vm365_vm13, %v433_v45, 0.0  ;;  %vm367_vm15 = vcmp.ne.f32.partialorder %v1522_v17, -1.0  ;;  %v497_v63 = vsel %vm361_vm9, 1.0, %v1028_v52  ;;  %v436_v1 = vmul.f32 %v402_v54, %v402_v54 }
  0x89   : > { %v529_v24 = vadd.f32 %v528_v15, %v461_v44  ;;  %v562_v37 = vadd.f32 %v561_v29, %v492_v56  ;;  %v468_v38 = vsel %vm366_vm14, %v434_v18, 0.0  ;;  %vm368_vm0 = vcmp.ne.f32.partialorder %v334_v21, -1.0 }
  0x8a   : > { %v498_v4 = vsel %vm362_vm10, 1.0, %v1028_v52  ;;  %v437_v6 = vmul.f32 %v403_v58, %v403_v58  ;;  %v469_v39 = vsel %vm367_vm15, %v435_v60, 0.0  ;;  %vm369_vm1 = vcmp.ne.f32.partialorder %v1542_v27, -1.0 }
  0x8b   : > { %v530_v33 = vadd.f32 %v529_v24, %v462_v50  ;;  %v563_v46 = vadd.f32 %v562_v37, %v493_v0  ;;  %v499_v10 = vsel %vm363_vm11, 1.0, %v1028_v52  ;;  %v470_v44 = vsel %vm368_vm0, %v436_v1, 0.0 }
  0x8c   : > { %v500_v14 = vsel %vm364_vm12, 1.0, %v1028_v52  ;;  %v471_v15 = vsel %vm369_vm1, %v437_v6, 0.0  ;;  %v501_v61 = vsel %vm365_vm13, 1.0, %v1028_v52  ;;  %v502_v5 = vsel %vm366_vm14, 1.0, %v1028_v52 }
  0x8d   : > { %v531_v41 = vadd.f32 %v530_v33, %v463_v59  ;;  %v564_v55 = vadd.f32 %v563_v46, %v494_v42  ;;  %v503_v23 = vsel %vm367_vm15, 1.0, %v1028_v52  ;;  %v504_v12 = vsel %vm368_vm0, 1.0, %v1028_v52 }
  0x8f   : > { %v532_v49 = vadd.f32 %v531_v41, %v464_v3  ;;  %v565_v62 = vadd.f32 %v564_v55, %v495_v51 }
  0x91   : > { %v533_v57 = vadd.f32 %v532_v49, %v465_v13  ;;  %v566_v35 = vadd.f32 %v565_v62, %v496_v32 }
  0x93   : > { %v534_v30 = vadd.f32 %v533_v57, %v466_v22  ;;  %v567_v43 = vadd.f32 %v566_v35, %v497_v63 }
  0x95   : > { %v535_v2 = vadd.f32 %v534_v30, %v467_v26  ;;  %v568_v53 = vadd.f32 %v567_v43, %v498_v4 }
  0x97   : > { %v536_v7 = vadd.f32 %v535_v2, %v468_v38  ;;  %v569_v47 = vadd.f32 %v568_v53, %v499_v10 }
  0x99   : > { %v537_v11 = vadd.f32 %v536_v7, %v469_v39  ;;  %v570_v19 = vadd.f32 %v569_v47, %v500_v14 }
  0x9b   : > { %v538_v16 = vadd.f32 %v537_v11, %v470_v44  ;;  %v571_v20 = vadd.f32 %v570_v19, %v501_v61 }
  0x9d   : > { %v539_v50 = vadd.f32 %v538_v16, %v471_v15  ;;  %v572_v9 = vadd.f32 %v571_v20, %v502_v5 }
  0x9f   : > { %541 = vst [vmem:[%s252_s23] sm:$0xff] %v539_v50  ;;  %v573_v24 = vadd.f32 %v572_v9, %v503_v23 }
  0xa0   : > { %917 = shalt.err (!%p914_p11)
}
  0xa1   : > { %s918_s21 = scalar_lea.hbm %s1596_s22, 128  ;;  %s922_s11 = scalar_lea.hbm %s1685_s2, 256 }
  0xa2   : > { %p919_p1 = scmp.ne.s32.totalorder %s1596_s22, %s918_s21  ;;  %p923_p4 = scmp.lt.u32.totalorder %s1596_s22, %s1685_s2 }
  0xa3   : > { %p924_p6 = scmp.lt.u32.totalorder %s922_s11, %s918_s21  ;;  %p926_p0 = scmp.lt.u32.totalorder %s918_s21, %s1596_s22 }
  0xa4   : > { %p920_p5 = pnand %p919_p1, %p1697_p3 }
  0xa5   : > { %p925_p8 = por %p924_p6, %p923_p4 }
  0xa6   : > { %p921_p2 = pneg %p920_p5 }
  0xa7   : > { %p927_p12 = por %p926_p0, %p925_p8 }
  0xa9   : > { %p928_p13 = pnand %p927_p12, %p921_p2 }
  0xab   : > { %931 = shalt.err (!%p928_p13)
}
  0xac   : > { %773 = dma.vmem_to_hbm [thread:$0]  (%p1697_p3), %s1598_s5, 128, %s1596_s22, %s579_s29   ;;  %v505_v56 = vsel %vm369_vm1, 1.0, %v1028_v52  ;;  %v574_v25 = vadd.f32 %v573_v24, %v504_v12 }
  0xad   : > { %s259_s7 = scalar_lea.vmem [#allocation8], %s756_s24  ;;  %s1634_s18 = scalar_lea.hbm %s1686_s3, %s760_s19 }
  0xae   : > { %s610_s6 = sshll.u32 %s259_s7, 4  ;;  %v575_v28 = vadd.f32 %v574_v25, %v505_v56  ;;  %s584_s5 = scalar_lea.sflag [#allocation9], %s1219_s9  ;;  %s1636_s6 = int_to_ptr.vmem [resolvable:$true] %s610_s6 }
  0xaf   : > { %s932_s22 = scalar_lea.vmem %s1636_s6, 128  ;;  %s1030_s24 = smov [#allocation8]  }
  0xb0   : > { %577 = vst [vmem:[%s259_s7] sm:$0xff] %v575_v28  ;;  %p933_p7 = scmp.ne.s32.totalorder %s1636_s6, %s932_s22  ;;  %s936_s29 = sshll.u32 %s1030_s24, 4  ;;  %s937_s29 = int_to_ptr.vmem [resolvable:$false] %s936_s29 }
  0xb1   : > { %s938_s15 = scalar_lea.vmem %s937_s29, 256  ;;  %p939_p11 = scmp.lt.s32.totalorder %s1636_s6, %s937_s29 }
  0xb2   : > { %p934_p10 = pnand %p933_p7, %p1697_p3  ;;  %p940_p1 = scmp.lt.s32.totalorder %s938_s15, %s932_s22 }
  0xb4   : > { %p935_p9 = pneg %p934_p10  ;;  %p941_p5 = por %p940_p1, %p939_p11 }
  0xb6   : > { %p942_p2 = pnand %p941_p5, %p935_p9 }
  0xb8   : > { %945 = shalt.err (!%p942_p2)
}
  0xb9   : > { %s946_s9 = scalar_lea.hbm %s1634_s18, 128  ;;  %s950_s4 = scalar_lea.hbm %s1686_s3, 256 }
  0xba   : > { %p947_p4 = scmp.ne.s32.totalorder %s1634_s18, %s946_s9  ;;  %p951_p0 = scmp.lt.u32.totalorder %s1634_s18, %s1686_s3 }
  0xbb   : > { %p952_p12 = scmp.lt.u32.totalorder %s950_s4, %s946_s9  ;;  %p954_p7 = scmp.lt.u32.totalorder %s946_s9, %s1634_s18 }
  0xbc   : > { %p948_p6 = pnand %p947_p4, %p1697_p3 }
  0xbd   : > { %p953_p13 = por %p952_p12, %p951_p0 }
  0xbe   : > { %p949_p8 = pneg %p948_p6 }
  0xbf   : > { %p955_p10 = por %p954_p7, %p953_p13 }
  0xc1   : > { %p956_p9 = pnand %p955_p10, %p949_p8 }
  0xc3   : > { %959 = shalt.err (!%p956_p9)
}
  0xc4   : > { %774 = dma.vmem_to_hbm [thread:$0]  (%p1697_p3), %s1636_s6, 128, %s1634_s18, %s584_s5  }
  0xc5 PF: > { %s622_s23 = sand.u32 1, %s1002_s12   ;;  %p1698_p11 = scmp.ne.s32.totalorder %s1692_s27, 0 }
  0xc6   : > { %p1699_p1 = scmp.ge.s32.totalorder %s1022_s17, 2  ;;  %s623_s8 = scalar_lea.sflag [#allocation4], %s622_s23 }
  0xc8   : > { %p785_p5 = pnand %p1699_p1, %p1698_p11 }
  0xca   : > { %993 = dma.done.wait (!%p785_p5), %s623_s8, 128  }
  0xcb   : > { %995 = vsyncadd (!%p785_p5), %s623_s8, 4294967168  ;;  %s632_s7 = scalar_lea.sflag [#allocation9], %s622_s23 }
  0xcc   : > { %997 = dma.done.wait (!%p785_p5), %s632_s7, 128  }
  0xcd   : > { %999 = vsyncadd (!%p785_p5), %s632_s7, 4294967168  ;;  %s26_s17 = sadd.s32 1, %s1022_s17   ;;  %s1700_s12 = smov %s1006_s13 }
  0xce   : > { %p23_p2 = scmp.ge.s32.totalorder %s26_s17, 4   ;;  %s1701_s13 = smov %s1010_s14 }
  0xcf   : > { %s1702_s14 = smov %s1107_s26  ;;  %s1703_s15 = smov %s1018_s16 }
  0xd0   : > { %s1704_s16 = smov %s1706_s20  ;;  %25 = sbr.rel (!%p23_p2) target bundleno = 10 (0xa), region = 107 }
  0xd7   :  { %637 = vsyncpa [#allocation3], 1 }
  0xd8   :  { %639 = vsyncpa [#allocation3 + $0x1], 1 }
  0xd9   :  { %640 = vsyncpa [#allocation6], 1 }
  0xda   :  { %642 = vsyncpa [#allocation6 + $0x1], 1 }
  0xdb   :  { %643 = vsyncpa [#allocation4], 1 }
  0xdc   :  { %645 = vsyncpa [#allocation4 + $0x1], 1 }
  0xdd   :  { %646 = vsyncpa [#allocation9], 1 }
  0xde   :  { %648 = vsyncpa [#allocation9 + $0x1], 1 }

</bundles_post_ra>
